<compile_context>
chip_gen: v6e
topology: v6e:2x2x1
jax: 0.10.0
libtpu: 0.0.40
codegen_flags: <defaults>
</compile_context>

<pallas_src>
import jax
import jax.numpy as jnp
from jax.experimental import pallas as pl
from jax.experimental.pallas import tpu as pltpu


N_OUT = 2        # final Linear output width (module spec)
N_OUT_PAD = 8    # padded to an 8-sublane-friendly width; sliced off outside

_MIN_TILE = 16   # bf16 packs 2 rows per sublane -> keep row tiles %16
_MAX_TILE = 512  # large tiles amortize per-grid-step overhead (~85% HBM roofline)


def _round_up(x, m):
    return ((x + m - 1) // m) * m


# ----------------------------------------------------------------------------
# Pallas kernel: fused 3-layer MLP for one tile of rows.
# ----------------------------------------------------------------------------
def _mlp_kernel(x_ref, w1_ref, b1_ref, w2_ref, b2_ref, w3_ref, b3_ref, o_ref):
    # x arrives f32 (single HBM read); cast to bf16 on-chip for the MXU.
    x = x_ref[...].astype(jnp.bfloat16)
    # Layer 1: (tm,32)bf16 @ (32,64)bf16 -> f32 acc; bias+ReLU in f32 (VPU).
    h = jnp.dot(x, w1_ref[...], preferred_element_type=jnp.float32)
    h = jnp.maximum(h + b1_ref[...], 0.0)
    # Layer 2: (tm,64) @ (64,32).
    h = jnp.dot(h.astype(jnp.bfloat16), w2_ref[...],
                preferred_element_type=jnp.float32)
    h = jnp.maximum(h + b2_ref[...], 0.0)
    # Layer 3 (no ReLU): (tm,32) @ (32,8); only 32 B/row written back.
    h = jnp.dot(h.astype(jnp.bfloat16), w3_ref[...],
                preferred_element_type=jnp.float32)
    o_ref[...] = h + b3_ref[...]


# ----------------------------------------------------------------------------
# Row tiling: >=2 grid steps when possible (both v7x TCs), big tiles at large M.
# ----------------------------------------------------------------------------
def _row_tiling(M):
    Mp = _round_up(M, _MIN_TILE)
    if Mp <= 2 * _MIN_TILE:                       # tiny batch: single tile
        return Mp, Mp
    if Mp <= 2 * _MAX_TILE:                       # mid batch: split in two
        tm = _round_up((Mp + 1) // 2, _MIN_TILE)
        return 2 * tm, tm
    Mp = _round_up(Mp, _MAX_TILE)                 # large batch: 512-row tiles
    return Mp, _MAX_TILE


# ----------------------------------------------------------------------------
# Forward wrapper. `prepared` comes from prepare_params() (done once at init).
# ----------------------------------------------------------------------------
def mlp_forward(prepared, x):
    """x: (M, input_size) f32 -> (M, 2) f32."""
    M, K = x.shape
    H1 = prepared["w1"].shape[1]
    H2 = prepared["w2"].shape[1]
    NP = prepared["w3"].shape[1]

    Mp, tm = _row_tiling(M)
    xp = x if Mp == M else jnp.pad(x, ((0, Mp - M), (0, 0)))

    out = pl.pallas_call(
        _mlp_kernel,
        out_shape=jax.ShapeDtypeStruct((Mp, NP), jnp.float32),
        grid=(Mp // tm,),
        in_specs=[
            pl.BlockSpec((tm, K), lambda i: (i, 0)),    # x tile (f32, K unpadded)
            pl.BlockSpec((K, H1), lambda i: (0, 0)),    # W1 (resident, bf16)
            pl.BlockSpec((1, H1), lambda i: (0, 0)),    # b1 (f32)
            pl.BlockSpec((H1, H2), lambda i: (0, 0)),   # W2
            pl.BlockSpec((1, H2), lambda i: (0, 0)),    # b2
            pl.BlockSpec((H2, NP), lambda i: (0, 0)),   # W3 (out dim padded to 8)
            pl.BlockSpec((1, NP), lambda i: (0, 0)),    # b3
        ],
        out_specs=pl.BlockSpec((tm, NP), lambda i: (i, 0)),
        compiler_params=pltpu.CompilerParams(
            dimension_semantics=("parallel",),
        ),
    )(xp, prepared["w1"], prepared["b1"], prepared["w2"], prepared["b2"],
      prepared["w3"], prepared["b3"])

    return out[:M, :N_OUT]


# ----------------------------------------------------------------------------
# Parameters: xavier_uniform weights, bias = 0.01 (matches the torch init fn).
# ----------------------------------------------------------------------------
def init_params(key, input_size, hidden_size):
    dims = [(input_size, hidden_size[0]),
            (hidden_size[0], hidden_size[1]),
            (hidden_size[1], N_OUT)]
    params = {}
    for idx, (fin, fout) in enumerate(dims, start=1):
        key, kw = jax.random.split(key)
        bound = jnp.sqrt(6.0 / (fin + fout))                 # xavier_uniform_
        params[f"w{idx}"] = jax.random.uniform(
            kw, (fin, fout), jnp.float32, -bound, bound)
        params[f"b{idx}"] = jnp.full((fout,), 0.01, jnp.float32)  # bias.fill_(0.01)
    return params


def prepare_params(params):
    """One-time, init-side kernel-layout prep (NOT per forward call):
    bf16 MXU weights, output dim padded 2->8, biases as (1, H) f32."""
    w3 = params["w3"]
    w3p = jnp.pad(w3, ((0, 0), (0, N_OUT_PAD - w3.shape[1])))
    b3p = jnp.pad(params["b3"], (0, N_OUT_PAD - params["b3"].shape[0]))
    return {
        "w1": params["w1"].astype(jnp.bfloat16),
        "b1": params["b1"].reshape(1, -1),
        "w2": params["w2"].astype(jnp.bfloat16),
        "b2": params["b2"].reshape(1, -1),
        "w3": w3p.astype(jnp.bfloat16),
        "b3": b3p.reshape(1, -1),
    }


# ----------------------------------------------------------------------------
# Main
# ----------------------------------------------------------------------------
if __name__ == "__main__":
    input_size = 32
    hidden_size = (64, 32)
    batch = 2

    key = jax.random.PRNGKey(0)
    k_params, k_x = jax.random.split(key)

    params = init_params(k_params, input_size, hidden_size)
    prepared = jax.tree_util.tree_map(jax.block_until_ready,
                                      prepare_params(params))
    x = jax.random.normal(k_x, (batch, input_size), jnp.float32)

    fwd = jax.jit(mlp_forward)
    out = fwd(prepared, x)
    out = jax.block_until_ready(out)

    assert out.shape == (batch, N_OUT), out.shape
    assert bool(jnp.all(jnp.isfinite(out)))

    # Loose-tolerance check vs a pure-JAX f32 reference (kernel uses bf16 MXU
    # operands, so allow ~1e-2-scale deviation).
    def ref_fwd(p, xx):
        h = jnp.maximum(xx @ p["w1"] + p["b1"], 0.0)
        h = jnp.maximum(h @ p["w2"] + p["b2"], 0.0)
        return h @ p["w3"] + p["b3"]

    ref = ref_fwd(params, x)
    assert bool(jnp.allclose(out, ref, rtol=5e-2, atol=5e-2))

    print("KERNEL_OK")
</pallas_src>

<mosaic_0001>
module attributes {stable_mosaic.version = 11 : i64} {
  func.func @_mlp_kernel(%arg0: i32, %arg1: memref<16x32xf32, #tpu.memory_space<vmem>>, %arg2: memref<32x64xbf16, #tpu.memory_space<vmem>>, %arg3: memref<1x64xf32, #tpu.memory_space<vmem>>, %arg4: memref<64x32xbf16, #tpu.memory_space<vmem>>, %arg5: memref<1x32xf32, #tpu.memory_space<vmem>>, %arg6: memref<32x8xbf16, #tpu.memory_space<vmem>>, %arg7: memref<1x8xf32, #tpu.memory_space<vmem>>, %arg8: memref<16x8xf32, #tpu.memory_space<vmem>>) attributes {dimension_semantics = [#tpu.dimension_semantics<parallel>], iteration_bounds = array<i64: 1>, scalar_prefetch = 0 : i64, scratch_operands = 0 : i64, tpu.core_type = #tpu.core_type<tc>, window_params = [{transform_indices = @transform_0, window_bounds = array<i64: 16, 32>}, {pipeline_mode = #tpu.pipeline_mode<synchronous>, transform_indices = @transform_1, window_bounds = array<i64: 32, 64>}, {pipeline_mode = #tpu.pipeline_mode<synchronous>, transform_indices = @transform_2, window_bounds = array<i64: 1, 64>}, {pipeline_mode = #tpu.pipeline_mode<synchronous>, transform_indices = @transform_3, window_bounds = array<i64: 64, 32>}, {pipeline_mode = #tpu.pipeline_mode<synchronous>, transform_indices = @transform_4, window_bounds = array<i64: 1, 32>}, {pipeline_mode = #tpu.pipeline_mode<synchronous>, transform_indices = @transform_5, window_bounds = array<i64: 32, 8>}, {pipeline_mode = #tpu.pipeline_mode<synchronous>, transform_indices = @transform_6, window_bounds = array<i64: 1, 8>}, {transform_indices = @transform_7, window_bounds = array<i64: 16, 8>}]} {
    %c0 = arith.constant 0 : index
    %c0_0 = arith.constant 0 : index
    %0 = vector.load %arg1[%c0, %c0_0] : memref<16x32xf32, #tpu.memory_space<vmem>>, vector<16x32xf32>
    %1 = arith.truncf %0 : vector<16x32xf32> to vector<16x32xbf16>
    %c0_1 = arith.constant 0 : index
    %c0_2 = arith.constant 0 : index
    %2 = vector.load %arg2[%c0_1, %c0_2] : memref<32x64xbf16, #tpu.memory_space<vmem>>, vector<32x64xbf16>
    %cst = arith.constant dense<0.000000e+00> : vector<16x64xf32>
    %3 = tpu.matmul %1, %2, %cst {dimension_numbers = #tpu.dot_dimension_numbers<[1], [0], [0], [1], [0, 0, 1, 1], [], []>} : vector<16x32xbf16>, vector<32x64xbf16>, vector<16x64xf32> -> vector<16x64xf32>
    %c0_3 = arith.constant 0 : index
    %c0_4 = arith.constant 0 : index
    %4 = vector.load %arg3[%c0_3, %c0_4] : memref<1x64xf32, #tpu.memory_space<vmem>>, vector<1x64xf32>
    %5 = vector.broadcast %4 : vector<1x64xf32> to vector<16x64xf32>
    %6 = arith.addf %3, %5 : vector<16x64xf32>
    %cst_5 = arith.constant 0.000000e+00 : f32
    %7 = vector.broadcast %cst_5 : f32 to vector<16x64xf32>
    %8 = arith.maximumf %6, %7 : vector<16x64xf32>
    %9 = arith.truncf %8 : vector<16x64xf32> to vector<16x64xbf16>
    %c0_6 = arith.constant 0 : index
    %c0_7 = arith.constant 0 : index
    %10 = vector.load %arg4[%c0_6, %c0_7] : memref<64x32xbf16, #tpu.memory_space<vmem>>, vector<64x32xbf16>
    %cst_8 = arith.constant dense<0.000000e+00> : vector<16x32xf32>
    %11 = tpu.matmul %9, %10, %cst_8 {dimension_numbers = #tpu.dot_dimension_numbers<[1], [0], [0], [1], [0, 0, 1, 1], [], []>} : vector<16x64xbf16>, vector<64x32xbf16>, vector<16x32xf32> -> vector<16x32xf32>
    %c0_9 = arith.constant 0 : index
    %c0_10 = arith.constant 0 : index
    %12 = vector.load %arg5[%c0_9, %c0_10] : memref<1x32xf32, #tpu.memory_space<vmem>>, vector<1x32xf32>
    %13 = vector.broadcast %12 : vector<1x32xf32> to vector<16x32xf32>
    %14 = arith.addf %11, %13 : vector<16x32xf32>
    %cst_11 = arith.constant 0.000000e+00 : f32
    %15 = vector.broadcast %cst_11 : f32 to vector<16x32xf32>
    %16 = arith.maximumf %14, %15 : vector<16x32xf32>
    %17 = arith.truncf %16 : vector<16x32xf32> to vector<16x32xbf16>
    %c0_12 = arith.constant 0 : index
    %c0_13 = arith.constant 0 : index
    %18 = vector.load %arg6[%c0_12, %c0_13] : memref<32x8xbf16, #tpu.memory_space<vmem>>, vector<32x8xbf16>
    %cst_14 = arith.constant dense<0.000000e+00> : vector<16x8xf32>
    %19 = tpu.matmul %17, %18, %cst_14 {dimension_numbers = #tpu.dot_dimension_numbers<[1], [0], [0], [1], [0, 0, 1, 1], [], []>} : vector<16x32xbf16>, vector<32x8xbf16>, vector<16x8xf32> -> vector<16x8xf32>
    %c0_15 = arith.constant 0 : index
    %c0_16 = arith.constant 0 : index
    %20 = vector.load %arg7[%c0_15, %c0_16] : memref<1x8xf32, #tpu.memory_space<vmem>>, vector<1x8xf32>
    %21 = vector.broadcast %20 : vector<1x8xf32> to vector<16x8xf32>
    %22 = arith.addf %19, %21 : vector<16x8xf32>
    %c0_17 = arith.constant 0 : index
    %c0_18 = arith.constant 0 : index
    %23 = vector.load %arg8[%c0_17, %c0_18] : memref<16x8xf32, #tpu.memory_space<vmem>>, vector<16x8xf32>
    tpu.vector_store %arg8[%c0_17, %c0_18], %22 {strides = array<i32>} : memref<16x8xf32, #tpu.memory_space<vmem>>, vector<16x8xf32>,
    return
  }
  func.func @transform_0(%arg0: i32) -> (i32, i32) {
    %c0_i32 = arith.constant 0 : i32
    %c0_i32_0 = arith.constant 0 : i32
    return %arg0, %c0_i32 : i32, i32
  }
  func.func @transform_1(%arg0: i32) -> (i32, i32) {
    %c0_i32 = arith.constant 0 : i32
    %c0_i32_0 = arith.constant 0 : i32
    %c0_i32_1 = arith.constant 0 : i32
    return %c0_i32, %c0_i32_0 : i32, i32
  }
  func.func @transform_2(%arg0: i32) -> (i32, i32) {
    %c0_i32 = arith.constant 0 : i32
    %c0_i32_0 = arith.constant 0 : i32
    %c0_i32_1 = arith.constant 0 : i32
    return %c0_i32, %c0_i32_0 : i32, i32
  }
  func.func @transform_3(%arg0: i32) -> (i32, i32) {
    %c0_i32 = arith.constant 0 : i32
    %c0_i32_0 = arith.constant 0 : i32
    %c0_i32_1 = arith.constant 0 : i32
    return %c0_i32, %c0_i32_0 : i32, i32
  }
  func.func @transform_4(%arg0: i32) -> (i32, i32) {
    %c0_i32 = arith.constant 0 : i32
    %c0_i32_0 = arith.constant 0 : i32
    %c0_i32_1 = arith.constant 0 : i32
    return %c0_i32, %c0_i32_0 : i32, i32
  }
  func.func @transform_5(%arg0: i32) -> (i32, i32) {
    %c0_i32 = arith.constant 0 : i32
    %c0_i32_0 = arith.constant 0 : i32
    %c0_i32_1 = arith.constant 0 : i32
    return %c0_i32, %c0_i32_0 : i32, i32
  }
  func.func @transform_6(%arg0: i32) -> (i32, i32) {
    %c0_i32 = arith.constant 0 : i32
    %c0_i32_0 = arith.constant 0 : i32
    %c0_i32_1 = arith.constant 0 : i32
    return %c0_i32, %c0_i32_0 : i32, i32
  }
  func.func @transform_7(%arg0: i32) -> (i32, i32) {
    %c0_i32 = arith.constant 0 : i32
    %c0_i32_0 = arith.constant 0 : i32
    return %arg0, %c0_i32 : i32, i32
  }
}

</mosaic_0001>

<bundles_post_ra>
// kernel: mlp_forward.1
= control target key start
LH: loop header
LB: loop body
LE: loop exit
PB: predicated region body
PF: predicated region fallthrough
CT: control target
= control target key end

     0   :  { %v325_v0 = vmov 0.0   ;;  %vm326_vm0 = vmmov 0   ;;  %vm53_vm1 = vcmask 261120   ;;  %vm140_vm2 = vcmask 523264   ;;  %s417_s1 = inlined_call_operand.vmem [shape: bf16[32,64], index: 1, kind: input, shape index: {}]   ;;  %s418_s0 = inlined_call_operand.vmem [shape: f32[16,32], index: 0, kind: input, shape index: {}]   ;;  %s419_s3 = inlined_call_operand.vmem [shape: bf16[64,32], index: 3, kind: input, shape index: {}]   ;;  %s420_s2 = inlined_call_operand.vmem [shape: f32[1,64], index: 2, kind: input, shape index: {}]   ;;  %s421_s5 = inlined_call_operand.vmem [shape: bf16[32,8], index: 5, kind: input, shape index: {}]   ;;  %s422_s4 = inlined_call_operand.vmem [shape: f32[1,32], index: 4, kind: input, shape index: {}]   ;;  %s423_s6 = inlined_call_operand.vmem [shape: f32[1,8], index: 6, kind: input, shape index: {}]   ;;  %s424_s7 = inlined_call_operand.vmem [shape: f32[16,8], index: 7, kind: output, shape index: {}]  }
   0x1   :  { %287 = vmatprep.subr.bf16.mxu0 %v325_v0  ;;  %v317_v1 = vld [vmem:[%s417_s1 + $0x8] sm:$0xff]   ;;  %291 = vmatprep.mubr.msk.bf16.mxu0 %vm326_vm0, %v325_v0  ;;  %v318_v2 = vld [vmem:[%s417_s1] sm:$0xff]   ;;  %v319_v5 = vld [vmem:[%s419_s3 + $0x18] sm:$0xff]   ;;  %vm255_vm3 = vcmask 64512  }
   0x2   :  { %295 = vmatprep.subr.bf16.mxu1 %v325_v0  ;;  %303 = vmatprep.mubr.msk.bf16.mxu1 %vm326_vm0, %v325_v0  ;;  %v27_v3 = vld [vmem:[%s418_s0] sm:$0xff]  ;;  %v28_v4 = vld [vmem:[%s418_s0 + $0x8] sm:$0xff]  ;;  %v320_v7 = vld [vmem:[%s419_s3 + $0x10] sm:$0xff]  }
   0x3   :  { %288 = vmatpush3.bf16.msra.mxu0 %v317_v1  ;;  %v29_v6 = vpack.c.bf16 %v28_v4, %v27_v3  ;;  %296 = vmatpush3.bf16.msra.mxu1 %v319_v5  ;;  %v321_v8 = vld [vmem:[%s419_s3 + $0x8] sm:$0xff]   ;;  %v322_v9 = vld [vmem:[%s419_s3] sm:$0xff]  }
   0x4   :  { %289 = vmatprep.subr.bf16.mxu0 %v325_v0  ;;  %297 = vmatprep.subr.bf16.mxu1 %v325_v0  ;;  %v262_v10 = vld [vmem:[%s420_s2] ss:$0 sm:$0xff]  ;;  %v323_v20 = vld [vmem:[%s421_s5 + $0x8] sm:$0xff]  }
   0x5   :  { %v324_v21 = vld [vmem:[%s421_s5] sm:$0xff]  }
   0x6   :  { %v266_v22 = vld [vmem:[%s422_s4] ss:$0 sm:$0xff] }
   0x7   :  { %290 = vmatpush3.bf16.msra.mxu0 %v318_v2  ;;  %298 = vmatpush3.bf16.msra.mxu1 %v320_v7  ;;  %v272_v32 = vld [vmem:[%s423_s6] ss:$0 sm:$0xff] }
   0x8   :  { %307 = vmatprep.subr.bf16.mxu0 %v325_v0  ;;  %299 = vmatprep.subr.bf16.mxu1 %v325_v0 }
   0xa   :  { %292 = vmatmul.mubr.msk.bf16.vlgmr.msra.gmra.mxu0 %vm53_vm1, %v29_v6 }
   0xb   :  { %311 = vmatprep.mubr.msk.bf16.mxu0 %vm326_vm0, %v325_v0  ;;  %300 = vmatpush3.bf16.msra.mxu1 %v321_v8 }
   0xc   :  { %301 = vmatprep.subr.bf16.mxu1 %v325_v0  ;;  %308 = vmatpush3.bf16.msra.mxu0 %v323_v20 }
   0xd   :  { %309 = vmatprep.subr.bf16.mxu0 %v325_v0 }
   0xf   :  { %302 = vmatpush3.bf16.msra.mxu1 %v322_v9 }
  0x10   :  { %310 = vmatpush3.bf16.msra.mxu0 %v324_v21 }
  0xca   :  { %v91_v11 = vpop.f32.mrf.mxu0 }
  0xcb   :  { %v92_v13 = vadd.f32 %v262_v10, %v91_v11 }
  0xcc   :  { %v293_v12 = vpop.f32.mrf.mxu0 }
  0xcd   :  { %v98_v17 = vmax.f32 %v92_v13, 0.0 }
  0xce   :  { %v94_v14 = vpop.f32.mrf.mxu0 }
  0xcf   :  { %v95_v15 = vadd.f32 %v262_v10, %v94_v14 }
  0xd0   :  { %v294_v16 = vpop.f32.mrf.mxu0 }
  0xd1   :  { %v99_v18 = vmax.f32 %v95_v15, 0.0 }
  0xd3   :  { %v100_v19 = vpack.c.bf16 %v99_v18, %v98_v17 }
  0xd5   :  { %304 = vmatmul.mubr.msk.bf16.vlgmr.msra.gmra.mxu1 %vm140_vm2, %v100_v19 }
 0x195   :  { %v178_v23 = vpop.f32.mrf.mxu1 }
 0x196   :  { %v179_v25 = vadd.f32 %v266_v22, %v178_v23 }
 0x197   :  { %v305_v24 = vpop.f32.mrf.mxu1 }
 0x198   :  { %v185_v29 = vmax.f32 %v179_v25, 0.0 }
 0x199   :  { %v181_v26 = vpop.f32.mrf.mxu1 }
 0x19a   :  { %v182_v27 = vadd.f32 %v266_v22, %v181_v26 }
 0x19b   :  { %v306_v28 = vpop.f32.mrf.mxu1 }
 0x19c   :  { %v186_v30 = vmax.f32 %v182_v27, 0.0 }
 0x19e   :  { %v187_v31 = vpack.c.bf16 %v186_v30, %v185_v29 }
 0x1a0   :  { %312 = vmatmul.mubr.msk.bf16.vlgmr.msra.gmra.mxu0 %vm53_vm1, %v187_v31 }
 0x260   :  { %v248_v33 = vpop.f32.mrf.mxu0 }
 0x261   :  { %v249_v34 = vadd.f32 %v272_v32, %v248_v33 }
 0x262   :  { %v313_v35 = vpop.f32.mrf.mxu0 }
 0x263   :  { %256 = vst.msk [vmem:[%s424_s7] sm:$0xff] %vm255_vm3, %v249_v34 }
 0x264   :  { %v251_v36 = vpop.f32.mrf.mxu0 }
 0x265   :  { %v252_v37 = vadd.f32 %v272_v32, %v251_v36 }
 0x266   :  { %v314_v38 = vpop.f32.mrf.mxu0 }
 0x267   :  { %257 = vst.msk [vmem:[%s424_s7 + $0x8] sm:$0xff] %vm255_vm3, %v252_v37 }

</bundles_post_ra>
